<compile_context>
chip_gen: v7x
topology: tpu7x:2x2x1
jax: 0.10.0
libtpu: 0.0.40
codegen_flags: <defaults>
</compile_context>

<pallas_src>
import math

import jax
import jax.numpy as jnp
from jax.experimental import pallas as pl
from jax.experimental.pallas import tpu as pltpu

LANE = 128
SUBLANE = 8


def _round_up(x, m):
    return (x + m - 1) // m * m


# ------------------------------ kernel --------------------------------------


def attention_fusion_kernel(x1_ref, x2_ref, wv_ref, bv_ref, wc_ref, bc_ref,
                            o_ref):
    """One (tb, Dp) batch slab:  out = Wc @ tanh(Wv @ x2 + bv) + bc + x1."""
    x1 = x1_ref[...].astype(jnp.float32)                       # (tb, Dp)
    x2 = x2_ref[...]

    # v-projection: bf16 MXU matmul, f32 accumulation, f32 elementwise.
    v = jnp.tanh(
        jnp.dot(x2.astype(jnp.bfloat16), wv_ref[...],
                preferred_element_type=jnp.float32) + bv_ref[...])

    # softmax(dim=1) over the size-1 query axis is identically 1.0, so the
    # attention output equals v -> the q/k branch is dead and eliminated.

    out = jnp.dot(v.astype(jnp.bfloat16), wc_ref[...],
                  preferred_element_type=jnp.float32) + bc_ref[...]
    o_ref[...] = (out + x1).astype(o_ref.dtype)


# --------------------------- param preparation ------------------------------


def prepare_params(params, weight_dtype=jnp.bfloat16):
    """Cast live weights to the MXU dtype and zero-pad features to 128 lanes."""
    d = params['w_v'].shape[0]
    d_pad = _round_up(d, LANE)
    pw = d_pad - d

    def pad_w(w):
        return jnp.pad(w.astype(weight_dtype), ((0, pw), (0, pw)))

    def pad_b(b):
        return jnp.pad(b.astype(jnp.float32), ((0, 0), (0, pw)))

    return {
        'w_v': pad_w(params['w_v']), 'b_v': pad_b(params['b_v']),
        'w_c': pad_w(params['w_c']), 'b_c': pad_b(params['b_c']),
        'd': d, 'd_pad': d_pad,
    }


# ------------------------------ tiling --------------------------------------


def _pick_batch_block(batch, d_pad, w_bytes, x_bytes, o_bytes,
                      budget_bytes=44 << 20):
    """Largest MXU-friendly batch tile that fits a v7x-safe VMEM budget."""
    # Resident weights + biases (worst case: double-buffered).
    resident = 2 * (2 * d_pad * d_pad * w_bytes + 2 * d_pad * 4)
    # Per batch row: double-buffered x1/x2/out tiles + ~4 f32 live rows.
    per_row = d_pad * (2 * (2 * x_bytes + o_bytes) + 4 * 4)
    avail = max(budget_bytes - resident, per_row * SUBLANE)
    max_tb = max(avail // per_row, SUBLANE)

    tb = SUBLANE
    for cand in (1024, 512, 256, 128, 64, 32, 16, 8):
        if cand <= max_tb:
            tb = cand
            break

    if batch <= tb:
        # Whole batch fits in one slab; still split into two 8-row-aligned
        # steps when possible so v7x's two TensorCores both get work.
        if batch >= 2 * SUBLANE and batch % (2 * SUBLANE) == 0:
            tb = batch // 2
        else:
            tb = batch
    return tb


def _vmem_footprint(tb, d_pad, w_bytes, x_bytes, o_bytes, weight_bufs):
    wbuf = weight_bufs * (2 * d_pad * d_pad * w_bytes + 2 * d_pad * 4)
    io = 2 * tb * d_pad * (2 * x_bytes + o_bytes)
    live = 4 * tb * d_pad * 4
    return wbuf + io + live


# ------------------------------ wrapper --------------------------------------


def attention_fusion(x1, x2, prepped):
    b, d = x1.shape
    d_pad = prepped['d_pad']
    assert prepped['d'] == d
    out_dtype = x1.dtype

    if d_pad != d:
        x1p = jnp.pad(x1, ((0, 0), (0, d_pad - d)))
        x2p = jnp.pad(x2, ((0, 0), (0, d_pad - d)))
    else:
        x1p, x2p = x1, x2

    ws = (prepped['w_v'], prepped['b_v'], prepped['w_c'], prepped['b_c'])
    w_bytes = ws[0].dtype.itemsize
    x_bytes = x1p.dtype.itemsize
    o_bytes = jnp.dtype(out_dtype).itemsize

    tb = _pick_batch_block(b, d_pad, w_bytes, x_bytes, o_bytes)
    grid = (pl.cdiv(b, tb),)

    cost = pl.CostEstimate(
        flops=4 * b * d_pad * d_pad,            # two (tb,Dp)x(Dp,Dp) matmuls
        transcendentals=b * d_pad,              # tanh
        bytes_accessed=(2 * b * d_pad * x_bytes + b * d_pad * o_bytes
                        + 2 * d_pad * d_pad * w_bytes + 2 * d_pad * 4))

    x_spec = pl.BlockSpec((tb, d_pad), lambda i: (i, 0))
    out_spec = pl.BlockSpec((tb, d_pad), lambda i: (i, 0))

    def run(single_buffer_weights):
        def w_spec(arr):
            if single_buffer_weights:
                # Constant index_map -> weights stay resident; double
                # buffering them only wastes VMEM (matters on v7x's 64 MiB).
                return pl.BlockSpec(arr.shape, lambda i: (0, 0),
                                    pipeline_mode=pl.Buffered(buffer_count=1))
            return pl.BlockSpec(arr.shape, lambda i: (0, 0))

        weight_bufs = 1 if single_buffer_weights else 2
        footprint = _vmem_footprint(tb, d_pad, w_bytes, x_bytes, o_bytes,
                                    weight_bufs)
        vmem_limit = min(max(int(footprint * 1.25), 32 << 20), 64 << 20)

        return pl.pallas_call(
            attention_fusion_kernel,
            out_shape=jax.ShapeDtypeStruct((b, d_pad), out_dtype),
            grid=grid,
            in_specs=[x_spec, x_spec] + [w_spec(w) for w in ws],
            out_specs=out_spec,
            cost_estimate=cost,
            compiler_params=pltpu.CompilerParams(
                dimension_semantics=("parallel",),
                vmem_limit_bytes=vmem_limit),
        )(x1p, x2p, *ws)

    try:
        out = run(single_buffer_weights=True)
    except Exception:
        # pl.Buffered(1) not supported on this jax version -> default buffering.
        out = run(single_buffer_weights=False)

    return out[:, :d] if d_pad != d else out


# --------------------------- pure-JAX references ------------------------------


def attention_fusion_ref_f32(x1, x2, p):
    """Full-fidelity f32 reference of the module dataflow (q/k included)."""
    d = x1.shape[-1]
    q = jnp.tanh(x1 @ p['w_q'] + p['b_q'])
    k = jnp.tanh(x2 @ p['w_k'] + p['b_k'])
    v = jnp.tanh(x2 @ p['w_v'] + p['b_v'])
    s = jnp.sum(q * k, axis=-1, keepdims=True) / math.sqrt(d)
    w = jax.nn.softmax(s, axis=-1)        # softmax over a size-1 axis -> ones
    new_v = w * v
    return new_v @ p['w_c'] + p['b_c'] + x1


def attention_fusion_ref_bf16(x1, x2, p):
    """Reference mirroring the kernel's bf16-matmul / f32-accumulate math."""
    wv = p['w_v'].astype(jnp.bfloat16)
    wc = p['w_c'].astype(jnp.bfloat16)
    v = jnp.tanh(jnp.dot(x2.astype(jnp.bfloat16), wv,
                         preferred_element_type=jnp.float32) + p['b_v'])
    out = jnp.dot(v.astype(jnp.bfloat16), wc,
                  preferred_element_type=jnp.float32) + p['b_c']
    return out + x1


# ------------------------------ params ---------------------------------------


def init_params(key, embed_dim):
    ks = jax.random.split(key, 8)
    limit = 1.0 / math.sqrt(embed_dim)

    def mat(k):
        return jax.random.uniform(k, (embed_dim, embed_dim), jnp.float32,
                                  -limit, limit)

    def vec(k):
        return jax.random.uniform(k, (1, embed_dim), jnp.float32,
                                  -limit, limit)

    return {'w_q': mat(ks[0]), 'b_q': vec(ks[1]),
            'w_k': mat(ks[2]), 'b_k': vec(ks[3]),
            'w_v': mat(ks[4]), 'b_v': vec(ks[5]),
            'w_c': mat(ks[6]), 'b_c': vec(ks[7])}


# -------------------------------- main ----------------------------------------


if __name__ == "__main__":
    B, D = 16, 32          # batch, embed_dim (toy; D is padded to 128 lanes)
    key = jax.random.PRNGKey(0)
    k1, k2, kw = jax.random.split(key, 3)

    text_features1 = jax.random.normal(k1, (B, D), jnp.float32)
    text_features2 = jax.random.normal(k2, (B, D), jnp.float32)
    params = init_params(kw, D)
    prepped = prepare_params(params)

    out = attention_fusion(text_features1, text_features2, prepped)
    out = jax.block_until_ready(out)

    ref_bf16 = attention_fusion_ref_bf16(text_features1, text_features2, params)
    ref_f32 = attention_fusion_ref_f32(text_features1, text_features2, params)

    assert out.shape == (B, D) and out.dtype == jnp.float32
    assert bool(jnp.all(jnp.isfinite(out)))
    # Tight check vs. a reference using the same bf16-matmul arithmetic.
    assert bool(jnp.allclose(out, ref_bf16, rtol=2e-3, atol=2e-3))
    # Loose check vs. the full-fidelity f32 module (incl. dead q/k/softmax).
    assert bool(jnp.allclose(out, ref_f32, rtol=5e-2, atol=1e-1))
    print("KERNEL_OK")
</pallas_src>

<mosaic_0001>
module attributes {stable_mosaic.version = 11 : i64} {
  func.func @attention_fusion_kernel(%arg0: i32, %arg1: memref<8x128xf32, #tpu.memory_space<vmem>>, %arg2: memref<8x128xf32, #tpu.memory_space<vmem>>, %arg3: memref<128x128xbf16, #tpu.memory_space<vmem>>, %arg4: memref<1x128xf32, #tpu.memory_space<vmem>>, %arg5: memref<128x128xbf16, #tpu.memory_space<vmem>>, %arg6: memref<1x128xf32, #tpu.memory_space<vmem>>, %arg7: memref<8x128xf32, #tpu.memory_space<vmem>>) attributes {dimension_semantics = [#tpu.dimension_semantics<parallel>], iteration_bounds = array<i64: 2>, scalar_prefetch = 0 : i64, scratch_operands = 0 : i64, tpu.core_type = #tpu.core_type<tc>, window_params = [{transform_indices = @transform_0, window_bounds = array<i64: 8, 128>}, {transform_indices = @transform_1, window_bounds = array<i64: 8, 128>}, {pipeline_mode = #tpu.pipeline_mode<synchronous>, transform_indices = @transform_2, window_bounds = array<i64: 128, 128>}, {pipeline_mode = #tpu.pipeline_mode<synchronous>, transform_indices = @transform_3, window_bounds = array<i64: 1, 128>}, {pipeline_mode = #tpu.pipeline_mode<synchronous>, transform_indices = @transform_4, window_bounds = array<i64: 128, 128>}, {pipeline_mode = #tpu.pipeline_mode<synchronous>, transform_indices = @transform_5, window_bounds = array<i64: 1, 128>}, {transform_indices = @transform_6, window_bounds = array<i64: 8, 128>}]} {
    %c0 = arith.constant 0 : index
    %c0_0 = arith.constant 0 : index
    %0 = vector.load %arg1[%c0, %c0_0] : memref<8x128xf32, #tpu.memory_space<vmem>>, vector<8x128xf32>
    %c0_1 = arith.constant 0 : index
    %c0_2 = arith.constant 0 : index
    %1 = vector.load %arg2[%c0_1, %c0_2] : memref<8x128xf32, #tpu.memory_space<vmem>>, vector<8x128xf32>
    %2 = arith.truncf %1 : vector<8x128xf32> to vector<8x128xbf16>
    %c0_3 = arith.constant 0 : index
    %c0_4 = arith.constant 0 : index
    %3 = vector.load %arg3[%c0_3, %c0_4] : memref<128x128xbf16, #tpu.memory_space<vmem>>, vector<128x128xbf16>
    %cst = arith.constant dense<0.000000e+00> : vector<8x128xf32>
    %4 = tpu.matmul %2, %3, %cst {dimension_numbers = #tpu.dot_dimension_numbers<[1], [0], [0], [1], [0, 0, 1, 1], [], []>} : vector<8x128xbf16>, vector<128x128xbf16>, vector<8x128xf32> -> vector<8x128xf32>
    %c0_5 = arith.constant 0 : index
    %c0_6 = arith.constant 0 : index
    %5 = vector.load %arg4[%c0_5, %c0_6] : memref<1x128xf32, #tpu.memory_space<vmem>>, vector<1x128xf32>
    %6 = vector.broadcast %5 : vector<1x128xf32> to vector<8x128xf32>
    %7 = arith.addf %4, %6 : vector<8x128xf32>
    %8 = math.tanh %7 : vector<8x128xf32>
    %9 = arith.truncf %8 : vector<8x128xf32> to vector<8x128xbf16>
    %c0_7 = arith.constant 0 : index
    %c0_8 = arith.constant 0 : index
    %10 = vector.load %arg5[%c0_7, %c0_8] : memref<128x128xbf16, #tpu.memory_space<vmem>>, vector<128x128xbf16>
    %cst_9 = arith.constant dense<0.000000e+00> : vector<8x128xf32>
    %11 = tpu.matmul %9, %10, %cst_9 {dimension_numbers = #tpu.dot_dimension_numbers<[1], [0], [0], [1], [0, 0, 1, 1], [], []>} : vector<8x128xbf16>, vector<128x128xbf16>, vector<8x128xf32> -> vector<8x128xf32>
    %c0_10 = arith.constant 0 : index
    %c0_11 = arith.constant 0 : index
    %12 = vector.load %arg6[%c0_10, %c0_11] : memref<1x128xf32, #tpu.memory_space<vmem>>, vector<1x128xf32>
    %13 = vector.broadcast %12 : vector<1x128xf32> to vector<8x128xf32>
    %14 = arith.addf %11, %13 : vector<8x128xf32>
    %15 = arith.addf %14, %0 : vector<8x128xf32>
    %c0_12 = arith.constant 0 : index
    %c0_13 = arith.constant 0 : index
    %16 = vector.load %arg7[%c0_12, %c0_13] : memref<8x128xf32, #tpu.memory_space<vmem>>, vector<8x128xf32>
    tpu.vector_store %arg7[%c0_12, %c0_13], %15 {strides = array<i32>} : memref<8x128xf32, #tpu.memory_space<vmem>>, vector<8x128xf32>,
    return
  }
  func.func @transform_0(%arg0: i32) -> (i32, i32) {
    %c0_i32 = arith.constant 0 : i32
    %c0_i32_0 = arith.constant 0 : i32
    return %arg0, %c0_i32 : i32, i32
  }
  func.func @transform_1(%arg0: i32) -> (i32, i32) {
    %c0_i32 = arith.constant 0 : i32
    %c0_i32_0 = arith.constant 0 : i32
    return %arg0, %c0_i32 : i32, i32
  }
  func.func @transform_2(%arg0: i32) -> (i32, i32) {
    %c0_i32 = arith.constant 0 : i32
    %c0_i32_0 = arith.constant 0 : i32
    %c0_i32_1 = arith.constant 0 : i32
    return %c0_i32, %c0_i32_0 : i32, i32
  }
  func.func @transform_3(%arg0: i32) -> (i32, i32) {
    %c0_i32 = arith.constant 0 : i32
    %c0_i32_0 = arith.constant 0 : i32
    %c0_i32_1 = arith.constant 0 : i32
    return %c0_i32, %c0_i32_0 : i32, i32
  }
  func.func @transform_4(%arg0: i32) -> (i32, i32) {
    %c0_i32 = arith.constant 0 : i32
    %c0_i32_0 = arith.constant 0 : i32
    %c0_i32_1 = arith.constant 0 : i32
    return %c0_i32, %c0_i32_0 : i32, i32
  }
  func.func @transform_5(%arg0: i32) -> (i32, i32) {
    %c0_i32 = arith.constant 0 : i32
    %c0_i32_0 = arith.constant 0 : i32
    %c0_i32_1 = arith.constant 0 : i32
    return %c0_i32, %c0_i32_0 : i32, i32
  }
  func.func @transform_6(%arg0: i32) -> (i32, i32) {
    %c0_i32 = arith.constant 0 : i32
    %c0_i32_0 = arith.constant 0 : i32
    return %arg0, %c0_i32 : i32, i32
  }
}

module attributes {stable_mosaic.version = 11 : i64} {
  func.func @attention_fusion_kernel(%arg0: i32, %arg1: memref<8x128xf32, #tpu.memory_space<vmem>>, %arg2: memref<8x128xf32, #tpu.memory_space<vmem>>, %arg3: memref<128x128xbf16, #tpu.memory_space<vmem>>, %arg4: memref<1x128xf32, #tpu.memory_space<vmem>>, %arg5: memref<128x128xbf16, #tpu.memory_space<vmem>>, %arg6: memref<1x128xf32, #tpu.memory_space<vmem>>, %arg7: memref<8x128xf32, #tpu.memory_space<vmem>>) attributes {dimension_semantics = [#tpu.dimension_semantics<parallel>], iteration_bounds = array<i64: 2>, scalar_prefetch = 0 : i64, scratch_operands = 0 : i64, tpu.core_type = #tpu.core_type<tc>, window_params = [{transform_indices = @transform_0, window_bounds = array<i64: 8, 128>}, {transform_indices = @transform_1, window_bounds = array<i64: 8, 128>}, {pipeline_mode = #tpu.pipeline_mode<synchronous>, transform_indices = @transform_2, window_bounds = array<i64: 128, 128>}, {pipeline_mode = #tpu.pipeline_mode<synchronous>, transform_indices = @transform_3, window_bounds = array<i64: 1, 128>}, {pipeline_mode = #tpu.pipeline_mode<synchronous>, transform_indices = @transform_4, window_bounds = array<i64: 128, 128>}, {pipeline_mode = #tpu.pipeline_mode<synchronous>, transform_indices = @transform_5, window_bounds = array<i64: 1, 128>}, {transform_indices = @transform_6, window_bounds = array<i64: 8, 128>}]} {
    %c0 = arith.constant 0 : index
    %c0_0 = arith.constant 0 : index
    %0 = vector.load %arg1[%c0, %c0_0] : memref<8x128xf32, #tpu.memory_space<vmem>>, vector<8x128xf32>
    %c0_1 = arith.constant 0 : index
    %c0_2 = arith.constant 0 : index
    %1 = vector.load %arg2[%c0_1, %c0_2] : memref<8x128xf32, #tpu.memory_space<vmem>>, vector<8x128xf32>
    %2 = arith.truncf %1 : vector<8x128xf32> to vector<8x128xbf16>
    %c0_3 = arith.constant 0 : index
    %c0_4 = arith.constant 0 : index
    %3 = vector.load %arg3[%c0_3, %c0_4] : memref<128x128xbf16, #tpu.memory_space<vmem>>, vector<128x128xbf16>
    %cst = arith.constant dense<0.000000e+00> : vector<8x128xf32>
    %4 = tpu.matmul %2, %3, %cst {dimension_numbers = #tpu.dot_dimension_numbers<[1], [0], [0], [1], [0, 0, 1, 1], [], []>} : vector<8x128xbf16>, vector<128x128xbf16>, vector<8x128xf32> -> vector<8x128xf32>
    %c0_5 = arith.constant 0 : index
    %c0_6 = arith.constant 0 : index
    %5 = vector.load %arg4[%c0_5, %c0_6] : memref<1x128xf32, #tpu.memory_space<vmem>>, vector<1x128xf32>
    %6 = vector.broadcast %5 : vector<1x128xf32> to vector<8x128xf32>
    %7 = arith.addf %4, %6 : vector<8x128xf32>
    %8 = math.tanh %7 : vector<8x128xf32>
    %9 = arith.truncf %8 : vector<8x128xf32> to vector<8x128xbf16>
    %c0_7 = arith.constant 0 : index
    %c0_8 = arith.constant 0 : index
    %10 = vector.load %arg5[%c0_7, %c0_8] : memref<128x128xbf16, #tpu.memory_space<vmem>>, vector<128x128xbf16>
    %cst_9 = arith.constant dense<0.000000e+00> : vector<8x128xf32>
    %11 = tpu.matmul %9, %10, %cst_9 {dimension_numbers = #tpu.dot_dimension_numbers<[1], [0], [0], [1], [0, 0, 1, 1], [], []>} : vector<8x128xbf16>, vector<128x128xbf16>, vector<8x128xf32> -> vector<8x128xf32>
    %c0_10 = arith.constant 0 : index
    %c0_11 = arith.constant 0 : index
    %12 = vector.load %arg6[%c0_10, %c0_11] : memref<1x128xf32, #tpu.memory_space<vmem>>, vector<1x128xf32>
    %13 = vector.broadcast %12 : vector<1x128xf32> to vector<8x128xf32>
    %14 = arith.addf %11, %13 : vector<8x128xf32>
    %15 = arith.addf %14, %0 : vector<8x128xf32>
    %c0_12 = arith.constant 0 : index
    %c0_13 = arith.constant 0 : index
    %16 = vector.load %arg7[%c0_12, %c0_13] : memref<8x128xf32, #tpu.memory_space<vmem>>, vector<8x128xf32>
    tpu.vector_store %arg7[%c0_12, %c0_13], %15 {strides = array<i32>} : memref<8x128xf32, #tpu.memory_space<vmem>>, vector<8x128xf32>,
    return
  }
  func.func @transform_0(%arg0: i32) -> (i32, i32) {
    %c0_i32 = arith.constant 0 : i32
    %c0_i32_0 = arith.constant 0 : i32
    return %arg0, %c0_i32 : i32, i32
  }
  func.func @transform_1(%arg0: i32) -> (i32, i32) {
    %c0_i32 = arith.constant 0 : i32
    %c0_i32_0 = arith.constant 0 : i32
    return %arg0, %c0_i32 : i32, i32
  }
  func.func @transform_2(%arg0: i32) -> (i32, i32) {
    %c0_i32 = arith.constant 0 : i32
    %c0_i32_0 = arith.constant 0 : i32
    %c0_i32_1 = arith.constant 0 : i32
    return %c0_i32, %c0_i32_0 : i32, i32
  }
  func.func @transform_3(%arg0: i32) -> (i32, i32) {
    %c0_i32 = arith.constant 0 : i32
    %c0_i32_0 = arith.constant 0 : i32
    %c0_i32_1 = arith.constant 0 : i32
    return %c0_i32, %c0_i32_0 : i32, i32
  }
  func.func @transform_4(%arg0: i32) -> (i32, i32) {
    %c0_i32 = arith.constant 0 : i32
    %c0_i32_0 = arith.constant 0 : i32
    %c0_i32_1 = arith.constant 0 : i32
    return %c0_i32, %c0_i32_0 : i32, i32
  }
  func.func @transform_5(%arg0: i32) -> (i32, i32) {
    %c0_i32 = arith.constant 0 : i32
    %c0_i32_0 = arith.constant 0 : i32
    %c0_i32_1 = arith.constant 0 : i32
    return %c0_i32, %c0_i32_0 : i32, i32
  }
  func.func @transform_6(%arg0: i32) -> (i32, i32) {
    %c0_i32 = arith.constant 0 : i32
    %c0_i32_0 = arith.constant 0 : i32
    return %arg0, %c0_i32 : i32, i32
  }
}

</mosaic_0001>

<bundles_post_ra>
// kernel: tpu_custom_call.1
= control target key start
LH: loop header
LB: loop body
LE: loop exit
PB: predicated region body
PF: predicated region fallthrough
CT: control target
= control target key end

     0   :  { %s1402_s0 = inlined_call_operand.hbm [shape: f32[16,128], index: 0, kind: input, shape index: {}]   ;;  %s1403_s1 = inlined_call_operand.hbm [shape: f32[16,128], index: 1, kind: input, shape index: {}]   ;;  %s1404_s2 = inlined_call_operand.hbm [shape: bf16[128,128], index: 2, kind: input, shape index: {}]   ;;  %s1405_s3 = inlined_call_operand.vmem [shape: f32[1,128], index: 3, kind: input, shape index: {}]   ;;  %s1406_s4 = inlined_call_operand.hbm [shape: bf16[128,128], index: 4, kind: input, shape index: {}]   ;;  %s1407_s5 = inlined_call_operand.vmem [shape: f32[1,128], index: 5, kind: input, shape index: {}]   ;;  %s1408_s6 = inlined_call_operand.hbm [shape: f32[16,128], index: 6, kind: output, shape index: {}]  }
   0x1   :  { %1413 = sst [smem:[#allocation17_spill]] %s1404_s2 }
   0x2   :  { %1414 = sst [smem:[#allocation18_spill]] %s1406_s4 }
   0x3   :  { %11 = vsyncpa [#allocation3], 0 }
   0x4   :  { %13 = vsyncpa [#allocation3 + $0x1], 0 }
   0x5   :  { %14 = vsyncpa [#allocation6], 0 }
   0x6   :  { %16 = vsyncpa [#allocation6 + $0x1], 0 }
   0x7   :  { %17 = vsyncpa [#allocation9], 0 }
   0x8   :  { %18 = vsyncpa [#allocation4], 0 }
   0x9   :  { %20 = vsyncpa [#allocation4 + $0x1], 0  ;;  %s1118_s21 = smov 0   ;;  %s1120_s22 = smov 0  }
   0xa   :  { %s1122_s23 = smov 0   ;;  %s1124_s24 = smov 0  }
   0xb LB: > { %s1139_s25 = sadd.s32 4294967295, %s1072_s24   ;;  %s689_s26 = sadd.s32 4294967294, %s1072_s24   ;;  %s1072_s24 = sphi %s1124_s24, %s1438_s24   ;;  %s1068_s23 = sphi %s1122_s23, %s1437_s23   ;;  %s1064_s22 = sphi %s1120_s22, %s1436_s22   ;;  %s1060_s21 = sphi %s1118_s21, %s1435_s21  }
   0xc   : > { %p46_p0 = scmp.ne.s32.totalorder %s1064_s22, %s1060_s21  ;;  %p1409_p1 = scmp.eq.s32.totalorder %s1139_s25, 0 }
   0xd   : > { %p186_p3 = scmp.eq.s32.totalorder %s689_s26, 1  ;;  %p690_p5 = scmp.ge.s32.totalorder %s1072_s24, 1 }
   0xe   : > { %p1148_p4 = por %p1409_p1, %p46_p0  ;;  %p193_p7 = scmp.lt.s32.totalorder %s1072_s24, 3 }
   0xf   : > { %p1153_p6 = por %p186_p3, %p46_p0  ;;  %s1074_s30 = smov [#allocation7]  }
  0x10   : > { %s1415_s27 = scalar_select %p1148_p4, 1, 0 }
  0x11   : > { %s1416_s28 = scalar_select %p1153_p6, 1, 0 }
  0x12   : > { %p1158_p8 = pnand %p690_p5, %p193_p7  ;;  %s205_s7 = sshll.u32 %s1074_s30, 4  ;;  %s1162_s7 = int_to_ptr.vmem [resolvable:$true] %s205_s7 }
  0x13   : > { %s1075_s9 = smov [#allocation8]   ;;  %s1419_s2 = sld [smem:[#allocation17_spill]] }
  0x14   : > { %s1417_s29 = scalar_select %p1158_p8, 1, 0 }
  0x15   : > { %p798_p9 = pneg %p1158_p8  ;;  %s221_s10 = sshll.u32 %s1075_s9, 4  ;;  %s1173_s10 = int_to_ptr.vmem [resolvable:$true] %s221_s10 }
  0x17   : > { %p1169_p11 = pnand %p798_p9, %p1409_p1 }
  0x19   : > { %s878_s13 = scalar_lea.hbm %s1419_s2, 1024  ;;  %p880_p13 = pneg %p1169_p11 }
  0x1a   : > { %p879_p12 = scmp.ne.s32.totalorder %s1419_s2, %s878_s13  ;;  %p885_p5 = scmp.lt.u32.totalorder %s878_s13, %s1419_s2 }
  0x1c   : > { %p881_p0 = pnand %p880_p13, %p879_p12 }
  0x1e   : > { %p882_p3 = pneg %p881_p0 }
  0x20   : > { %p887_p7 = pnand %p885_p5, %p882_p3 }
  0x22   : > { %890 = shalt.err (!%p887_p7)
}
  0x23   : > { %s891_s18 = scalar_lea.vmem %s1162_s7, 1024  ;;  %p899_p2 = scmp.lt.s32.totalorder %s1162_s7, %s1162_s7 }
  0x24   : > { %p892_p9 = scmp.ne.s32.totalorder %s1162_s7, %s891_s18  ;;  %p900_p12 = scmp.lt.s32.totalorder %s891_s18, %s891_s18 }
  0x26   : > { %p894_p10 = pnand %p892_p9, %p880_p13  ;;  %p901_p0 = por %p900_p12, %p899_p2 }
  0x28   : > { %p895_p1 = pneg %p894_p10 }
  0x2a   : > { %p902_p6 = pnand %p901_p0, %p895_p1 }
  0x2c   : > { %905 = shalt.err (!%p902_p6)
}
  0x2d   : > { %s1076_s19 = smov 64   ;;  %s1077_s20 = smov 4  }
  0x2e   : > { %801 = dma.hbm_to_vmem [thread:$0]  (!%p1169_p11), %s1419_s2, 1024, %s1162_s7, [#allocation6], %s1076_s19, %s1076_s19, %s1077_s20  }
  0x2f   : > { %s1420_s4 = sld [smem:[#allocation18_spill]] }
  0x35   : > { %s906_s12 = scalar_lea.hbm %s1420_s4, 1024 }
  0x36   : > { %p907_p2 = scmp.ne.s32.totalorder %s1420_s4, %s906_s12  ;;  %p913_p10 = scmp.lt.u32.totalorder %s906_s12, %s1420_s4 }
  0x38   : > { %p909_p1 = pnand %p907_p2, %p880_p13 }
  0x3a   : > { %p910_p6 = pneg %p909_p1 }
  0x3c   : > { %p915_p3 = pnand %p913_p10, %p910_p6 }
  0x3e   : > { %918 = shalt.err (!%p915_p3)
}
  0x3f   : > { %s919_s7 = scalar_lea.vmem %s1173_s10, 1024  ;;  %p927_p12 = scmp.lt.s32.totalorder %s1173_s10, %s1173_s10 }
  0x40   : > { %p920_p5 = scmp.ne.s32.totalorder %s1173_s10, %s919_s7  ;;  %p928_p0 = scmp.lt.s32.totalorder %s919_s7, %s919_s7 }
  0x42   : > { %p922_p7 = pnand %p920_p5, %p880_p13  ;;  %p929_p2 = por %p928_p0, %p927_p12 }
  0x44   : > { %p923_p9 = pneg %p922_p7 }
  0x46   : > { %p930_p1 = pnand %p929_p2, %p923_p9 }
  0x48   : > { %933 = shalt.err (!%p930_p1)
}
  0x49   : > { %804 = dma.hbm_to_vmem [thread:$0]  (!%p1169_p11), %s1420_s4, 1024, %s1173_s10, [#allocation9], %s1076_s19, %s1076_s19, %s1077_s20  }
  0x4a   : > { %s1228_s26 = sadd.s32 1, %s1072_s24   ;;  %s33_s8 = sadd.s32 1, %s1068_s23 }
  0x4b   : > { %s30_s30 = ssub.s32 %s1072_s24, %s1228_s26  ;;  %p40_p13 = scmp.ne.s32.totalorder %s1068_s23, %s1064_s22 }
  0x4c   : > { %p31_p6 = scmp.eq.s32.totalorder %s30_s30, 0  ;;  %p41_p10 = scmp.eq.s32.totalorder %s1072_s24, 0 }
  0x4d   : > { %p1421_p3 = scmp.eq.s32.totalorder %s1139_s25, 1  ;;  %p818_p7 = scmp.lt.s32.totalorder %s1072_s24, 2 }
  0x4e   : > { %s1244_s11 = scalar_select %p31_p6, %s1068_s23, %s33_s8  }
  0x4f   : > { %p1238_p5 = por %p1421_p3, %p40_p13  ;;  %p42_p9 = por %p41_p10, %p40_p13 }
  0x50   : > { %1423 = sst [smem:[#allocation16_spill]] %s1244_s11  ;;  %s238_s12 = sand.u32 1, %s1068_s23  }
  0x51   : > { %s1422_s9 = scalar_select %p1238_p5, 1, 0 }
  0x52   : > { %s1247_s10 = sshll.u32 %s238_s12, 3  ;;  %s695_s19 = sshll.u32 %s1072_s24, 7 }
  0x53   : > { %s1253_s14 = scalar_lea.hbm %s1402_s0, %s695_s19  ;;  %s242_s15 = scalar_lea.vmem [#allocation2], %s1247_s10 }
  0x54   : > { %s249_s16 = sshll.u32 %s242_s15, 4  ;;  %p1258_p11 = pnand %p818_p7, %p42_p9  ;;  %s1256_s16 = int_to_ptr.vmem [resolvable:$true] %s249_s16 }
  0x55   : > { %s1265_s8 = scalar_lea.hbm %s1403_s1, %s695_s19  ;;  %s256_s30 = sand.u32 1, %s1072_s24  }
  0x56   : > { %s239_s20 = scalar_lea.sflag [#allocation3], %s238_s12  ;;  %s934_s13 = scalar_lea.hbm %s1253_s14, 128 }
  0x57   : > { %p935_p12 = scmp.ne.s32.totalorder %s1253_s14, %s934_s13  ;;  %p936_p0 = pneg %p1258_p11 }
  0x58   : > { %s939_s4 = scalar_lea.hbm %s1402_s0, 256  ;;  %p940_p13 = scmp.lt.u32.totalorder %s1253_s14, %s1402_s0 }
  0x59   : > { %p937_p2 = pnand %p936_p0, %p935_p12  ;;  %p941_p6 = scmp.lt.u32.totalorder %s939_s4, %s934_s13 }
  0x5a   : > { %p943_p3 = scmp.lt.u32.totalorder %s934_s13, %s1253_s14 }
  0x5b   : > { %p938_p1 = pneg %p937_p2  ;;  %p942_p10 = por %p941_p6, %p940_p13 }
  0x5d   : > { %p944_p7 = por %p943_p3, %p942_p10 }
  0x5f   : > { %p945_p9 = pnand %p944_p7, %p938_p1 }
  0x61   : > { %948 = shalt.err (!%p945_p9)
}
  0x62   : > { %s949_s12 = scalar_lea.vmem %s1256_s16, 128  ;;  %s1078_s2 = smov [#allocation2]  }
  0x63   : > { %p950_p12 = scmp.ne.s32.totalorder %s1256_s16, %s949_s12  ;;  %s954_s19 = sshll.u32 %s1078_s2, 4  ;;  %s955_s19 = int_to_ptr.vmem [resolvable:$false] %s954_s19 }
  0x64   : > { %s956_s11 = scalar_lea.vmem %s955_s19, 256  ;;  %p957_p4 = scmp.lt.s32.totalorder %s1256_s16, %s955_s19 }
  0x65   : > { %p952_p2 = pnand %p950_p12, %p936_p0  ;;  %p958_p13 = scmp.lt.s32.totalorder %s956_s11, %s949_s12 }
  0x67   : > { %p953_p5 = pneg %p952_p2  ;;  %p959_p6 = por %p958_p13, %p957_p4 }
  0x69   : > { %p960_p10 = pnand %p959_p6, %p953_p5 }
  0x6b   : > { %963 = shalt.err (!%p960_p10)
}
  0x6c   : > { %808 = dma.hbm_to_vmem [thread:$0]  (!%p1258_p11), %s1253_s14, 128, %s1256_s16, %s239_s20  }
  0x6d   : > { %s260_s4 = scalar_lea.vmem [#allocation5], %s1247_s10  ;;  %s257_s13 = scalar_lea.sflag [#allocation6], %s256_s30 }
  0x6e   : > { %s267_s18 = sshll.u32 %s260_s4, 4  ;;  %s964_s15 = scalar_lea.hbm %s1265_s8, 128  ;;  %s268_s18 = int_to_ptr.vmem [resolvable:$true] %s267_s18 }
  0x6f   : > { %p965_p4 = scmp.ne.s32.totalorder %s1265_s8, %s964_s15  ;;  %s969_s2 = scalar_lea.hbm %s1403_s1, 256 }
  0x70   : > { %p970_p3 = scmp.lt.u32.totalorder %s1265_s8, %s1403_s1  ;;  %p971_p7 = scmp.lt.u32.totalorder %s969_s2, %s964_s15 }
  0x71   : > { %p967_p5 = pnand %p965_p4, %p936_p0  ;;  %p973_p12 = scmp.lt.u32.totalorder %s964_s15, %s1265_s8 }
  0x72   : > { %p972_p9 = por %p971_p7, %p970_p3 }
  0x73   : > { %p968_p1 = pneg %p967_p5 }
  0x74   : > { %p974_p2 = por %p973_p12, %p972_p9 }
  0x76   : > { %p975_p13 = pnand %p974_p2, %p968_p1 }
  0x78   : > { %978 = shalt.err (!%p975_p13)
}
  0x79   : > { %s979_s10 = scalar_lea.vmem %s268_s18, 128  ;;  %s1079_s14 = smov [#allocation5]  }
  0x7a   : > { %p980_p6 = scmp.ne.s32.totalorder %s268_s18, %s979_s10  ;;  %s984_s16 = sshll.u32 %s1079_s14, 4  ;;  %s985_s16 = int_to_ptr.vmem [resolvable:$false] %s984_s16 }
  0x7b   : > { %s986_s30 = scalar_lea.vmem %s985_s16, 256  ;;  %p987_p5 = scmp.lt.s32.totalorder %s268_s18, %s985_s16 }
  0x7c   : > { %p982_p10 = pnand %p980_p6, %p936_p0  ;;  %p988_p8 = scmp.lt.s32.totalorder %s986_s30, %s979_s10 }
  0x7e   : > { %p983_p4 = pneg %p982_p10  ;;  %p989_p3 = por %p988_p8, %p987_p5 }
  0x80   : > { %p990_p7 = pnand %p989_p3, %p983_p4 }
  0x82   : > { %993 = shalt.err (!%p990_p7)
}
  0x83   : > { %811 = dma.hbm_to_vmem [thread:$0]  (!%p1258_p11), %s1265_s8, 128, %s268_s18, %s257_s13  }
  0x84   : > { %p1425_p1 = scmp.ne.s32.totalorder %s1417_s29, 0 }
  0x85   : > { %s1318_s20 = sand.u32 (!%p1425_p1), 1, %s1064_s22   ;;  %p1426_p8 = scmp.ne.s32.totalorder (!%p1425_p1), %s1415_s27, 0 }
  0x86   : > { %276 = sbr.rel (%p1425_p1) target bundleno = 643 (0x283), region = 44  ;;  %s1321_s4 = sshll.u32 (!%p1425_p1), %s1318_s20, 3 }
  0x87   : > { %s279_s15 = scalar_lea.sflag (!%p1425_p1), [#allocation3], %s1318_s20  ;;  %s282_s17 = scalar_lea.vmem (!%p1425_p1), [#allocation2], %s1321_s4 }
  0x8d   : > { %1039 = dma.done.wait (%p1426_p8), %s279_s15, 128  }
  0x8e   : > { %1041 = vsyncadd (%p1426_p8), %s279_s15, 4294967168  ;;  %s287_s29 = sand.u32 1, %s1139_s25   ;;  %s291_s8 = scalar_lea.vmem [#allocation5], %s1321_s4 }
  0x8f   : > { %s288_s7 = scalar_lea.sflag [#allocation6], %s287_s29 }
  0x90   : > { %1043 = dma.done.wait (%p1426_p8), %s288_s7, 128  }
  0x91   : > { %1045 = vsyncadd (%p1426_p8), %s288_s7, 4294967168  ;;  %p1427_p11 = scmp.eq.s32.totalorder %s1139_s25, 0 }
  0x93   : > { %1047 = dma.done.wait (%p1427_p11), [#allocation6], 1024   ;;  %p1428_p0 = pmov %p1427_p11 }
  0x95   : > { %1049 = vsyncadd (%p1428_p0), [#allocation6], 4294966272  ;;  %p1429_p9 = pmov %p1428_p0 }
  0x96   : > { %p1430_p12 = pmov %p1428_p0 }
  0x97   : > { %1051 = dma.done.wait (%p1429_p9), [#allocation9], 1024  }
  0x98   : > { %1053 = vsyncadd (%p1430_p12), [#allocation9], 4294966272  ;;  %v1080_v0 = vmov 0.0   ;;  %vm1081_vm0 = vmmov 0   ;;  %v860_v1 = vld [vmem:[#allocation7] sm:$0xff]   ;;  %v861_v2 = vld [vmem:[#allocation7 + $0x8] sm:$0xff]  }
  0x99   : > { %744 = vmatprep.subr.bf16.mxu0 %v1080_v0  ;;  %760 = vmatprep.mubr.msk.bf16.mxu0 %vm1081_vm0, %v1080_v0  ;;  %v862_v3 = vld [vmem:[#allocation7 + $0x10] sm:$0xff]   ;;  %v868_v4 = vld [vmem:[#allocation8] sm:$0xff]   ;;  %v863_v5 = vld [vmem:[#allocation7 + $0x18] sm:$0xff]   ;;  %s723_s2 = sshll.u32 %s1139_s25, 7  ;;  %s332_s19 = scalar_lea.vmem [#allocation10], %s1321_s4 }
  0x9a   : > { %764 = vmatprep.subr.bf16.mxu1 %v1080_v0  ;;  %780 = vmatprep.mubr.msk.bf16.mxu1 %vm1081_vm0, %v1080_v0  ;;  %v869_v6 = vld [vmem:[#allocation8 + $0x8] sm:$0xff]   ;;  %v864_v7 = vld [vmem:[#allocation7 + $0x20] sm:$0xff]   ;;  %v870_v8 = vld [vmem:[#allocation8 + $0x10] sm:$0xff]   ;;  %s577_s11 = sshll.u32 %s332_s19, 4  ;;  %s1358_s16 = scalar_lea.hbm %s1408_s6, %s723_s2  ;;  %s1360_s11 = int_to_ptr.vmem [resolvable:$true] %s577_s11 }
  0x9b   : > { %745 = vmatpush3.bf16.msra.mxu0 %v860_v1  ;;  %765 = vmatpush3.bf16.msra.mxu1 %v868_v4  ;;  %v865_v9 = vld [vmem:[#allocation7 + $0x28] sm:$0xff]   ;;  %v871_v10 = vld [vmem:[#allocation8 + $0x18] sm:$0xff]   ;;  %v866_v11 = vld [vmem:[#allocation7 + $0x30] sm:$0xff]   ;;  %s564_s30 = scalar_lea.sflag [#allocation4], %s1318_s20  ;;  %s994_s25 = scalar_lea.vmem %s1360_s11, 128 }
  0x9c   : > { %746 = vmatprep.subr.bf16.mxu0 %v1080_v0  ;;  %766 = vmatprep.subr.bf16.mxu1 %v1080_v0  ;;  %v867_v12 = vld [vmem:[#allocation7 + $0x38] sm:$0xff]   ;;  %v872_v15 = vld [vmem:[#allocation8 + $0x20] sm:$0xff]   ;;  %v873_v16 = vld [vmem:[#allocation8 + $0x28] sm:$0xff]   ;;  %p995_p2 = scmp.ne.s32.totalorder %s1360_s11, %s994_s25  ;;  %p1431_p13 = scmp.ne.s32.totalorder %s1422_s9, 0 }
  0x9d   : > { %v335_v13 = vld [vmem:[%s291_s8] sm:$0xff]  ;;  %v704_v19 = vld [vmem:[%s1405_s3] ss:$0 sm:$0xff]  ;;  %s1082_s4 = smov [#allocation10]  }
  0x9e   : > { %v336_v14 = vpack.c.bf16 %v335_v13, %v335_v13  ;;  %v874_v17 = vld [vmem:[#allocation8 + $0x30] sm:$0xff]   ;;  %v875_v18 = vld [vmem:[#allocation8 + $0x38] sm:$0xff]   ;;  %v713_v27 = vld [vmem:[%s1407_s5] ss:$0 sm:$0xff]  ;;  %p996_p6 = pnand %p995_p2, %p1431_p13  ;;  %s998_s15 = sshll.u32 %s1082_s4, 4  ;;  %s999_s15 = int_to_ptr.vmem [resolvable:$false] %s998_s15 }
  0x9f   : > { %747 = vmatpush3.bf16.msra.mxu0 %v861_v2  ;;  %767 = vmatpush3.bf16.msra.mxu1 %v869_v6  ;;  %v334_v28 = vld [vmem:[%s282_s17] sm:$0xff]  ;;  %s1000_s17 = scalar_lea.vmem %s999_s15, 256  ;;  %p1001_p4 = scmp.lt.s32.totalorder %s1360_s11, %s999_s15 }
  0xa0   : > { %748 = vmatprep.subr.bf16.mxu0 %v1080_v0  ;;  %768 = vmatprep.subr.bf16.mxu1 %v1080_v0  ;;  %p997_p10 = pneg %p996_p6  ;;  %p1002_p5 = scmp.lt.s32.totalorder %s1000_s17, %s994_s25 }
  0xa2   : > { %p1003_p3 = por %p1002_p5, %p1001_p4 }
  0xa3   : > { %749 = vmatpush3.bf16.msra.mxu0 %v862_v3  ;;  %769 = vmatpush3.bf16.msra.mxu1 %v870_v8 }
  0xa4   : > { %750 = vmatprep.subr.bf16.mxu0 %v1080_v0  ;;  %770 = vmatprep.subr.bf16.mxu1 %v1080_v0  ;;  %p1004_p7 = pnand %p1003_p3, %p997_p10 }
  0xa7   : > { %751 = vmatpush3.bf16.msra.mxu0 %v863_v5  ;;  %771 = vmatpush3.bf16.msra.mxu1 %v871_v10 }
  0xa8   : > { %752 = vmatprep.subr.bf16.mxu0 %v1080_v0  ;;  %772 = vmatprep.subr.bf16.mxu1 %v1080_v0 }
  0xab   : > { %753 = vmatpush3.bf16.msra.mxu0 %v864_v7  ;;  %773 = vmatpush3.bf16.msra.mxu1 %v872_v15 }
  0xac   : > { %754 = vmatprep.subr.bf16.mxu0 %v1080_v0  ;;  %774 = vmatprep.subr.bf16.mxu1 %v1080_v0 }
  0xaf   : > { %755 = vmatpush3.bf16.msra.mxu0 %v865_v9  ;;  %775 = vmatpush3.bf16.msra.mxu1 %v873_v16 }
  0xb0   : > { %756 = vmatprep.subr.bf16.mxu0 %v1080_v0  ;;  %776 = vmatprep.subr.bf16.mxu1 %v1080_v0 }
  0xb3   : > { %757 = vmatpush3.bf16.msra.mxu0 %v866_v11  ;;  %777 = vmatpush3.bf16.msra.mxu1 %v874_v17 }
  0xb4   : > { %758 = vmatprep.subr.bf16.mxu0 %v1080_v0  ;;  %778 = vmatprep.subr.bf16.mxu1 %v1080_v0 }
  0xb7   : > { %759 = vmatpush3.bf16.msra.mxu0 %v867_v12  ;;  %779 = vmatpush3.bf16.msra.mxu1 %v875_v18 }
  0xba   : > { %761 = vmatmul.mubr.bf16.vlgmr.msra.gmra.mrb[0].mxu0 %v336_v14 }
 0x18d   : > { %v442_v20 = vpop.f32.mrb[0].mxu0 }
 0x18e   : > { %v443_v21 = vadd.f32 %v704_v19, %v442_v20  ;;  %v762_v22 = vpop.f32.mrb[1].mxu0 }
 0x18f   : > { %v445_v23 = vpop.f32.mrb[2].mxu0 }
 0x190   : > { %876 = vtanh.f32 %v443_v21  ;;  %v763_v24 = vpop.f32.mrb[3].mxu0 }
 0x19a   : > { %v877_v25 = vpop.eup %876 }
 0x19b   : > { %v449_v26 = vpack.c.bf16 %v877_v25, %v877_v25 }
 0x19d   : > { %781 = vmatmul.mubr.bf16.vlgmr.msra.gmra.mrb[0].mxu1 %v449_v26 }
 0x270   : > { %v555_v29 = vpop.f32.mrb[0].mxu1 }
 0x271   : > { %v556_v30 = vadd.f32 %v713_v27, %v555_v29  ;;  %v782_v31 = vpop.f32.mrb[1].mxu1 }
 0x272   : > { %v558_v32 = vpop.f32.mrb[2].mxu1 }
 0x273   : > { %v561_v33 = vadd.f32 %v556_v30, %v334_v28  ;;  %v783_v34 = vpop.f32.mrb[3].mxu1 }
 0x275   : > { %562 = vst [vmem:[%s332_s19] sm:$0xff] %v561_v33 }
 0x276   : > { %1007 = shalt.err (!%p1004_p7)
}
 0x277   : > { %s1008_s20 = scalar_lea.hbm %s1358_s16, 128  ;;  %s1012_s8 = scalar_lea.hbm %s1408_s6, 256 }
 0x278   : > { %p1009_p1 = scmp.ne.s32.totalorder %s1358_s16, %s1008_s20  ;;  %p1013_p0 = scmp.lt.u32.totalorder %s1358_s16, %s1408_s6 }
 0x279   : > { %p1014_p9 = scmp.lt.u32.totalorder %s1012_s8, %s1008_s20  ;;  %p1016_p2 = scmp.lt.u32.totalorder %s1008_s20, %s1358_s16 }
 0x27a   : > { %p1010_p8 = pnand %p1009_p1, %p1431_p13 }
 0x27b   : > { %p1015_p12 = por %p1014_p9, %p1013_p0 }
 0x27c   : > { %p1011_p11 = pneg %p1010_p8 }
 0x27d   : > { %p1017_p6 = por %p1016_p2, %p1015_p12 }
 0x27f   : > { %p1018_p10 = pnand %p1017_p6, %p1011_p11 }
 0x281   : > { %1021 = shalt.err (!%p1018_p10)
}
 0x282   : > { %796 = dma.vmem_to_hbm [thread:$0]  (%p1431_p13), %s1360_s11, 128, %s1358_s16, %s564_s30  }
 0x283 PF: > { %s589_s13 = sand.u32 1, %s1060_s21   ;;  %p1432_p4 = scmp.ne.s32.totalorder %s1416_s28, 0 }
 0x284   : > { %p1433_p5 = scmp.ge.s32.totalorder %s1072_s24, 2  ;;  %s590_s12 = scalar_lea.sflag [#allocation4], %s589_s13 }
 0x286   : > { %p813_p3 = pnand %p1433_p5, %p1432_p4 }
 0x288   : > { %1055 = dma.done.wait (!%p813_p3), %s590_s12, 128  }
 0x289   : > { %1057 = vsyncadd (!%p813_p3), %s590_s12, 4294967168  ;;  %s1434_s2 = sld [smem:[#allocation16_spill]]  ;;  %p23_p7 = scmp.ge.s32.totalorder %s1228_s26, 4  }
 0x28a   : > { %s1435_s21 = smov %s1064_s22  ;;  %s1436_s22 = smov %s1068_s23 }
 0x28b   : > { %s1438_s24 = smov %s1228_s26  ;;  %25 = sbr.rel (!%p23_p7) target bundleno = 11 (0xb), region = 110 }
 0x28f   : > { %s1437_s23 = smov %s1434_s2 }
 0x292   :  { %595 = vsyncpa [#allocation3], 1 }
 0x293   :  { %597 = vsyncpa [#allocation3 + $0x1], 1 }
 0x294   :  { %598 = vsyncpa [#allocation6], 1 }
 0x295   :  { %600 = vsyncpa [#allocation6 + $0x1], 1 }
 0x296   :  { %601 = vsyncpa [#allocation9], 1 }
 0x297   :  { %602 = vsyncpa [#allocation4], 1 }
 0x298   :  { %604 = vsyncpa [#allocation4 + $0x1], 1 }

// kernel: tpu_custom_call.1
= control target key start
LH: loop header
LB: loop body
LE: loop exit
PB: predicated region body
PF: predicated region fallthrough
CT: control target
= control target key end

     0   :  { %s1402_s0 = inlined_call_operand.hbm [shape: f32[16,128], index: 0, kind: input, shape index: {}]   ;;  %s1403_s1 = inlined_call_operand.hbm [shape: f32[16,128], index: 1, kind: input, shape index: {}]   ;;  %s1404_s2 = inlined_call_operand.hbm [shape: bf16[128,128], index: 2, kind: input, shape index: {}]   ;;  %s1405_s3 = inlined_call_operand.vmem [shape: f32[1,128], index: 3, kind: input, shape index: {}]   ;;  %s1406_s4 = inlined_call_operand.hbm [shape: bf16[128,128], index: 4, kind: input, shape index: {}]   ;;  %s1407_s5 = inlined_call_operand.vmem [shape: f32[1,128], index: 5, kind: input, shape index: {}]   ;;  %s1408_s6 = inlined_call_operand.hbm [shape: f32[16,128], index: 6, kind: output, shape index: {}]  }
   0x1   :  { %1413 = sst [smem:[#allocation17_spill]] %s1404_s2 }
   0x2   :  { %1414 = sst [smem:[#allocation18_spill]] %s1406_s4 }
   0x3   :  { %11 = vsyncpa [#allocation3], 0 }
   0x4   :  { %13 = vsyncpa [#allocation3 + $0x1], 0 }
   0x5   :  { %14 = vsyncpa [#allocation6], 0 }
   0x6   :  { %16 = vsyncpa [#allocation6 + $0x1], 0 }
   0x7   :  { %17 = vsyncpa [#allocation9], 0 }
   0x8   :  { %18 = vsyncpa [#allocation4], 0 }
   0x9   :  { %20 = vsyncpa [#allocation4 + $0x1], 0  ;;  %s1118_s21 = smov 0   ;;  %s1120_s22 = smov 0  }
   0xa   :  { %s1122_s23 = smov 0   ;;  %s1124_s24 = smov 0  }
   0xb LB: > { %s1139_s25 = sadd.s32 4294967295, %s1072_s24   ;;  %s689_s26 = sadd.s32 4294967294, %s1072_s24   ;;  %s1072_s24 = sphi %s1124_s24, %s1438_s24   ;;  %s1068_s23 = sphi %s1122_s23, %s1437_s23   ;;  %s1064_s22 = sphi %s1120_s22, %s1436_s22   ;;  %s1060_s21 = sphi %s1118_s21, %s1435_s21  }
   0xc   : > { %p46_p0 = scmp.ne.s32.totalorder %s1064_s22, %s1060_s21  ;;  %p1409_p1 = scmp.eq.s32.totalorder %s1139_s25, 0 }
   0xd   : > { %p186_p3 = scmp.eq.s32.totalorder %s689_s26, 1  ;;  %p690_p5 = scmp.ge.s32.totalorder %s1072_s24, 1 }
   0xe   : > { %p1148_p4 = por %p1409_p1, %p46_p0  ;;  %p193_p7 = scmp.lt.s32.totalorder %s1072_s24, 3 }
   0xf   : > { %p1153_p6 = por %p186_p3, %p46_p0  ;;  %s1074_s30 = smov [#allocation7]  }
  0x10   : > { %s1415_s27 = scalar_select %p1148_p4, 1, 0 }
  0x11   : > { %s1416_s28 = scalar_select %p1153_p6, 1, 0 }
  0x12   : > { %p1158_p8 = pnand %p690_p5, %p193_p7  ;;  %s205_s7 = sshll.u32 %s1074_s30, 4  ;;  %s1162_s7 = int_to_ptr.vmem [resolvable:$true] %s205_s7 }
  0x13   : > { %s1075_s9 = smov [#allocation8]   ;;  %s1419_s2 = sld [smem:[#allocation17_spill]] }
  0x14   : > { %s1417_s29 = scalar_select %p1158_p8, 1, 0 }
  0x15   : > { %p798_p9 = pneg %p1158_p8  ;;  %s221_s10 = sshll.u32 %s1075_s9, 4  ;;  %s1173_s10 = int_to_ptr.vmem [resolvable:$true] %s221_s10 }
  0x17   : > { %p1169_p11 = pnand %p798_p9, %p1409_p1 }
  0x19   : > { %s878_s13 = scalar_lea.hbm %s1419_s2, 1024  ;;  %p880_p13 = pneg %p1169_p11 }
  0x1a   : > { %p879_p12 = scmp.ne.s32.totalorder %s1419_s2, %s878_s13  ;;  %p885_p5 = scmp.lt.u32.totalorder %s878_s13, %s1419_s2 }
  0x1c   : > { %p881_p0 = pnand %p880_p13, %p879_p12 }
  0x1e   : > { %p882_p3 = pneg %p881_p0 }
  0x20   : > { %p887_p7 = pnand %p885_p5, %p882_p3 }
  0x22   : > { %890 = shalt.err (!%p887_p7)
}
  0x23   : > { %s891_s18 = scalar_lea.vmem %s1162_s7, 1024  ;;  %p899_p2 = scmp.lt.s32.totalorder %s1162_s7, %s1162_s7 }
  0x24   : > { %p892_p9 = scmp.ne.s32.totalorder %s1162_s7, %s891_s18  ;;  %p900_p12 = scmp.lt.s32.totalorder %s891_s18, %s891_s18 }
  0x26   : > { %p894_p10 = pnand %p892_p9, %p880_p13  ;;  %p901_p0 = por %p900_p12, %p899_p2 }
  0x28   : > { %p895_p1 = pneg %p894_p10 }
  0x2a   : > { %p902_p6 = pnand %p901_p0, %p895_p1 }
  0x2c   : > { %905 = shalt.err (!%p902_p6)
}
  0x2d   : > { %s1076_s19 = smov 64   ;;  %s1077_s20 = smov 4  }
  0x2e   : > { %801 = dma.hbm_to_vmem [thread:$0]  (!%p1169_p11), %s1419_s2, 1024, %s1162_s7, [#allocation6], %s1076_s19, %s1076_s19, %s1077_s20  }
  0x2f   : > { %s1420_s4 = sld [smem:[#allocation18_spill]] }
  0x35   : > { %s906_s12 = scalar_lea.hbm %s1420_s4, 1024 }
  0x36   : > { %p907_p2 = scmp.ne.s32.totalorder %s1420_s4, %s906_s12  ;;  %p913_p10 = scmp.lt.u32.totalorder %s906_s12, %s1420_s4 }
  0x38   : > { %p909_p1 = pnand %p907_p2, %p880_p13 }
  0x3a   : > { %p910_p6 = pneg %p909_p1 }
  0x3c   : > { %p915_p3 = pnand %p913_p10, %p910_p6 }
  0x3e   : > { %918 = shalt.err (!%p915_p3)
}
  0x3f   : > { %s919_s7 = scalar_lea.vmem %s1173_s10, 1024  ;;  %p927_p12 = scmp.lt.s32.totalorder %s1173_s10, %s1173_s10 }
  0x40   : > { %p920_p5 = scmp.ne.s32.totalorder %s1173_s10, %s919_s7  ;;  %p928_p0 = scmp.lt.s32.totalorder %s919_s7, %s919_s7 }
  0x42   : > { %p922_p7 = pnand %p920_p5, %p880_p13  ;;  %p929_p2 = por %p928_p0, %p927_p12 }
  0x44   : > { %p923_p9 = pneg %p922_p7 }
  0x46   : > { %p930_p1 = pnand %p929_p2, %p923_p9 }
  0x48   : > { %933 = shalt.err (!%p930_p1)
}
  0x49   : > { %804 = dma.hbm_to_vmem [thread:$0]  (!%p1169_p11), %s1420_s4, 1024, %s1173_s10, [#allocation9], %s1076_s19, %s1076_s19, %s1077_s20  }
  0x4a   : > { %s1228_s26 = sadd.s32 1, %s1072_s24   ;;  %s33_s8 = sadd.s32 1, %s1068_s23 }
  0x4b   : > { %s30_s30 = ssub.s32 %s1072_s24, %s1228_s26  ;;  %p40_p13 = scmp.ne.s32.totalorder %s1068_s23, %s1064_s22 }
  0x4c   : > { %p31_p6 = scmp.eq.s32.totalorder %s30_s30, 0  ;;  %p41_p10 = scmp.eq.s32.totalorder %s1072_s24, 0 }
  0x4d   : > { %p1421_p3 = scmp.eq.s32.totalorder %s1139_s25, 1  ;;  %p818_p7 = scmp.lt.s32.totalorder %s1072_s24, 2 }
  0x4e   : > { %s1244_s11 = scalar_select %p31_p6, %s1068_s23, %s33_s8  }
  0x4f   : > { %p1238_p5 = por %p1421_p3, %p40_p13  ;;  %p42_p9 = por %p41_p10, %p40_p13 }
  0x50   : > { %1423 = sst [smem:[#allocation16_spill]] %s1244_s11  ;;  %s238_s12 = sand.u32 1, %s1068_s23  }
  0x51   : > { %s1422_s9 = scalar_select %p1238_p5, 1, 0 }
  0x52   : > { %s1247_s10 = sshll.u32 %s238_s12, 3  ;;  %s695_s19 = sshll.u32 %s1072_s24, 7 }
  0x53   : > { %s1253_s14 = scalar_lea.hbm %s1402_s0, %s695_s19  ;;  %s242_s15 = scalar_lea.vmem [#allocation2], %s1247_s10 }
  0x54   : > { %s249_s16 = sshll.u32 %s242_s15, 4  ;;  %p1258_p11 = pnand %p818_p7, %p42_p9  ;;  %s1256_s16 = int_to_ptr.vmem [resolvable:$true] %s249_s16 }
  0x55   : > { %s1265_s8 = scalar_lea.hbm %s1403_s1, %s695_s19  ;;  %s256_s30 = sand.u32 1, %s1072_s24  }
  0x56   : > { %s239_s20 = scalar_lea.sflag [#allocation3], %s238_s12  ;;  %s934_s13 = scalar_lea.hbm %s1253_s14, 128 }
  0x57   : > { %p935_p12 = scmp.ne.s32.totalorder %s1253_s14, %s934_s13  ;;  %p936_p0 = pneg %p1258_p11 }
  0x58   : > { %s939_s4 = scalar_lea.hbm %s1402_s0, 256  ;;  %p940_p13 = scmp.lt.u32.totalorder %s1253_s14, %s1402_s0 }
  0x59   : > { %p937_p2 = pnand %p936_p0, %p935_p12  ;;  %p941_p6 = scmp.lt.u32.totalorder %s939_s4, %s934_s13 }
  0x5a   : > { %p943_p3 = scmp.lt.u32.totalorder %s934_s13, %s1253_s14 }
  0x5b   : > { %p938_p1 = pneg %p937_p2  ;;  %p942_p10 = por %p941_p6, %p940_p13 }
  0x5d   : > { %p944_p7 = por %p943_p3, %p942_p10 }
  0x5f   : > { %p945_p9 = pnand %p944_p7, %p938_p1 }
  0x61   : > { %948 = shalt.err (!%p945_p9)
}
  0x62   : > { %s949_s12 = scalar_lea.vmem %s1256_s16, 128  ;;  %s1078_s2 = smov [#allocation2]  }
  0x63   : > { %p950_p12 = scmp.ne.s32.totalorder %s1256_s16, %s949_s12  ;;  %s954_s19 = sshll.u32 %s1078_s2, 4  ;;  %s955_s19 = int_to_ptr.vmem [resolvable:$false] %s954_s19 }
  0x64   : > { %s956_s11 = scalar_lea.vmem %s955_s19, 256  ;;  %p957_p4 = scmp.lt.s32.totalorder %s1256_s16, %s955_s19 }
  0x65   : > { %p952_p2 = pnand %p950_p12, %p936_p0  ;;  %p958_p13 = scmp.lt.s32.totalorder %s956_s11, %s949_s12 }
  0x67   : > { %p953_p5 = pneg %p952_p2  ;;  %p959_p6 = por %p958_p13, %p957_p4 }
  0x69   : > { %p960_p10 = pnand %p959_p6, %p953_p5 }
  0x6b   : > { %963 = shalt.err (!%p960_p10)
}
  0x6c   : > { %808 = dma.hbm_to_vmem [thread:$0]  (!%p1258_p11), %s1253_s14, 128, %s1256_s16, %s239_s20  }
  0x6d   : > { %s260_s4 = scalar_lea.vmem [#allocation5], %s1247_s10  ;;  %s257_s13 = scalar_lea.sflag [#allocation6], %s256_s30 }
  0x6e   : > { %s267_s18 = sshll.u32 %s260_s4, 4  ;;  %s964_s15 = scalar_lea.hbm %s1265_s8, 128  ;;  %s268_s18 = int_to_ptr.vmem [resolvable:$true] %s267_s18 }
  0x6f   : > { %p965_p4 = scmp.ne.s32.totalorder %s1265_s8, %s964_s15  ;;  %s969_s2 = scalar_lea.hbm %s1403_s1, 256 }
  0x70   : > { %p970_p3 = scmp.lt.u32.totalorder %s1265_s8, %s1403_s1  ;;  %p971_p7 = scmp.lt.u32.totalorder %s969_s2, %s964_s15 }
  0x71   : > { %p967_p5 = pnand %p965_p4, %p936_p0  ;;  %p973_p12 = scmp.lt.u32.totalorder %s964_s15, %s1265_s8 }
  0x72   : > { %p972_p9 = por %p971_p7, %p970_p3 }
  0x73   : > { %p968_p1 = pneg %p967_p5 }
  0x74   : > { %p974_p2 = por %p973_p12, %p972_p9 }
  0x76   : > { %p975_p13 = pnand %p974_p2, %p968_p1 }
  0x78   : > { %978 = shalt.err (!%p975_p13)
}
  0x79   : > { %s979_s10 = scalar_lea.vmem %s268_s18, 128  ;;  %s1079_s14 = smov [#allocation5]  }
  0x7a   : > { %p980_p6 = scmp.ne.s32.totalorder %s268_s18, %s979_s10  ;;  %s984_s16 = sshll.u32 %s1079_s14, 4  ;;  %s985_s16 = int_to_ptr.vmem [resolvable:$false] %s984_s16 }
  0x7b   : > { %s986_s30 = scalar_lea.vmem %s985_s16, 256  ;;  %p987_p5 = scmp.lt.s32.totalorder %s268_s18, %s985_s16 }
  0x7c   : > { %p982_p10 = pnand %p980_p6, %p936_p0  ;;  %p988_p8 = scmp.lt.s32.totalorder %s986_s30, %s979_s10 }
  0x7e   : > { %p983_p4 = pneg %p982_p10  ;;  %p989_p3 = por %p988_p8, %p987_p5 }
  0x80   : > { %p990_p7 = pnand %p989_p3, %p983_p4 }
  0x82   : > { %993 = shalt.err (!%p990_p7)
}
  0x83   : > { %811 = dma.hbm_to_vmem [thread:$0]  (!%p1258_p11), %s1265_s8, 128, %s268_s18, %s257_s13  }
  0x84   : > { %p1425_p1 = scmp.ne.s32.totalorder %s1417_s29, 0 }
  0x85   : > { %s1318_s20 = sand.u32 (!%p1425_p1), 1, %s1064_s22   ;;  %p1426_p8 = scmp.ne.s32.totalorder (!%p1425_p1), %s1415_s27, 0 }
  0x86   : > { %276 = sbr.rel (%p1425_p1) target bundleno = 643 (0x283), region = 44  ;;  %s1321_s4 = sshll.u32 (!%p1425_p1), %s1318_s20, 3 }
  0x87   : > { %s279_s15 = scalar_lea.sflag (!%p1425_p1), [#allocation3], %s1318_s20  ;;  %s282_s17 = scalar_lea.vmem (!%p1425_p1), [#allocation2], %s1321_s4 }
  0x8d   : > { %1039 = dma.done.wait (%p1426_p8), %s279_s15, 128  }
  0x8e   : > { %1041 = vsyncadd (%p1426_p8), %s279_s15, 4294967168  ;;  %s287_s29 = sand.u32 1, %s1139_s25   ;;  %s291_s8 = scalar_lea.vmem [#allocation5], %s1321_s4 }
  0x8f   : > { %s288_s7 = scalar_lea.sflag [#allocation6], %s287_s29 }
  0x90   : > { %1043 = dma.done.wait (%p1426_p8), %s288_s7, 128  }
  0x91   : > { %1045 = vsyncadd (%p1426_p8), %s288_s7, 4294967168  ;;  %p1427_p11 = scmp.eq.s32.totalorder %s1139_s25, 0 }
  0x93   : > { %1047 = dma.done.wait (%p1427_p11), [#allocation6], 1024   ;;  %p1428_p0 = pmov %p1427_p11 }
  0x95   : > { %1049 = vsyncadd (%p1428_p0), [#allocation6], 4294966272  ;;  %p1429_p9 = pmov %p1428_p0 }
  0x96   : > { %p1430_p12 = pmov %p1428_p0 }
  0x97   : > { %1051 = dma.done.wait (%p1429_p9), [#allocation9], 1024  }
  0x98   : > { %1053 = vsyncadd (%p1430_p12), [#allocation9], 4294966272  ;;  %v1080_v0 = vmov 0.0   ;;  %vm1081_vm0 = vmmov 0   ;;  %v860_v1 = vld [vmem:[#allocation7] sm:$0xff]   ;;  %v861_v2 = vld [vmem:[#allocation7 + $0x8] sm:$0xff]  }
  0x99   : > { %744 = vmatprep.subr.bf16.mxu0 %v1080_v0  ;;  %760 = vmatprep.mubr.msk.bf16.mxu0 %vm1081_vm0, %v1080_v0  ;;  %v862_v3 = vld [vmem:[#allocation7 + $0x10] sm:$0xff]   ;;  %v868_v4 = vld [vmem:[#allocation8] sm:$0xff]   ;;  %v863_v5 = vld [vmem:[#allocation7 + $0x18] sm:$0xff]   ;;  %s723_s2 = sshll.u32 %s1139_s25, 7  ;;  %s332_s19 = scalar_lea.vmem [#allocation10], %s1321_s4 }
  0x9a   : > { %764 = vmatprep.subr.bf16.mxu1 %v1080_v0  ;;  %780 = vmatprep.mubr.msk.bf16.mxu1 %vm1081_vm0, %v1080_v0  ;;  %v869_v6 = vld [vmem:[#allocation8 + $0x8] sm:$0xff]   ;;  %v864_v7 = vld [vmem:[#allocation7 + $0x20] sm:$0xff]   ;;  %v870_v8 = vld [vmem:[#allocation8 + $0x10] sm:$0xff]   ;;  %s577_s11 = sshll.u32 %s332_s19, 4  ;;  %s1358_s16 = scalar_lea.hbm %s1408_s6, %s723_s2  ;;  %s1360_s11 = int_to_ptr.vmem [resolvable:$true] %s577_s11 }
  0x9b   : > { %745 = vmatpush3.bf16.msra.mxu0 %v860_v1  ;;  %765 = vmatpush3.bf16.msra.mxu1 %v868_v4  ;;  %v865_v9 = vld [vmem:[#allocation7 + $0x28] sm:$0xff]   ;;  %v871_v10 = vld [vmem:[#allocation8 + $0x18] sm:$0xff]   ;;  %v866_v11 = vld [vmem:[#allocation7 + $0x30] sm:$0xff]   ;;  %s564_s30 = scalar_lea.sflag [#allocation4], %s1318_s20  ;;  %s994_s25 = scalar_lea.vmem %s1360_s11, 128 }
  0x9c   : > { %746 = vmatprep.subr.bf16.mxu0 %v1080_v0  ;;  %766 = vmatprep.subr.bf16.mxu1 %v1080_v0  ;;  %v867_v12 = vld [vmem:[#allocation7 + $0x38] sm:$0xff]   ;;  %v872_v15 = vld [vmem:[#allocation8 + $0x20] sm:$0xff]   ;;  %v873_v16 = vld [vmem:[#allocation8 + $0x28] sm:$0xff]   ;;  %p995_p2 = scmp.ne.s32.totalorder %s1360_s11, %s994_s25  ;;  %p1431_p13 = scmp.ne.s32.totalorder %s1422_s9, 0 }
  0x9d   : > { %v335_v13 = vld [vmem:[%s291_s8] sm:$0xff]  ;;  %v704_v19 = vld [vmem:[%s1405_s3] ss:$0 sm:$0xff]  ;;  %s1082_s4 = smov [#allocation10]  }
  0x9e   : > { %v336_v14 = vpack.c.bf16 %v335_v13, %v335_v13  ;;  %v874_v17 = vld [vmem:[#allocation8 + $0x30] sm:$0xff]   ;;  %v875_v18 = vld [vmem:[#allocation8 + $0x38] sm:$0xff]   ;;  %v713_v27 = vld [vmem:[%s1407_s5] ss:$0 sm:$0xff]  ;;  %p996_p6 = pnand %p995_p2, %p1431_p13  ;;  %s998_s15 = sshll.u32 %s1082_s4, 4  ;;  %s999_s15 = int_to_ptr.vmem [resolvable:$false] %s998_s15 }
  0x9f   : > { %747 = vmatpush3.bf16.msra.mxu0 %v861_v2  ;;  %767 = vmatpush3.bf16.msra.mxu1 %v869_v6  ;;  %v334_v28 = vld [vmem:[%s282_s17] sm:$0xff]  ;;  %s1000_s17 = scalar_lea.vmem %s999_s15, 256  ;;  %p1001_p4 = scmp.lt.s32.totalorder %s1360_s11, %s999_s15 }
  0xa0   : > { %748 = vmatprep.subr.bf16.mxu0 %v1080_v0  ;;  %768 = vmatprep.subr.bf16.mxu1 %v1080_v0  ;;  %p997_p10 = pneg %p996_p6  ;;  %p1002_p5 = scmp.lt.s32.totalorder %s1000_s17, %s994_s25 }
  0xa2   : > { %p1003_p3 = por %p1002_p5, %p1001_p4 }
  0xa3   : > { %749 = vmatpush3.bf16.msra.mxu0 %v862_v3  ;;  %769 = vmatpush3.bf16.msra.mxu1 %v870_v8 }
  0xa4   : > { %750 = vmatprep.subr.bf16.mxu0 %v1080_v0  ;;  %770 = vmatprep.subr.bf16.mxu1 %v1080_v0  ;;  %p1004_p7 = pnand %p1003_p3, %p997_p10 }
  0xa7   : > { %751 = vmatpush3.bf16.msra.mxu0 %v863_v5  ;;  %771 = vmatpush3.bf16.msra.mxu1 %v871_v10 }
  0xa8   : > { %752 = vmatprep.subr.bf16.mxu0 %v1080_v0  ;;  %772 = vmatprep.subr.bf16.mxu1 %v1080_v0 }
  0xab   : > { %753 = vmatpush3.bf16.msra.mxu0 %v864_v7  ;;  %773 = vmatpush3.bf16.msra.mxu1 %v872_v15 }
  0xac   : > { %754 = vmatprep.subr.bf16.mxu0 %v1080_v0  ;;  %774 = vmatprep.subr.bf16.mxu1 %v1080_v0 }
  0xaf   : > { %755 = vmatpush3.bf16.msra.mxu0 %v865_v9  ;;  %775 = vmatpush3.bf16.msra.mxu1 %v873_v16 }
  0xb0   : > { %756 = vmatprep.subr.bf16.mxu0 %v1080_v0  ;;  %776 = vmatprep.subr.bf16.mxu1 %v1080_v0 }
  0xb3   : > { %757 = vmatpush3.bf16.msra.mxu0 %v866_v11  ;;  %777 = vmatpush3.bf16.msra.mxu1 %v874_v17 }
  0xb4   : > { %758 = vmatprep.subr.bf16.mxu0 %v1080_v0  ;;  %778 = vmatprep.subr.bf16.mxu1 %v1080_v0 }
  0xb7   : > { %759 = vmatpush3.bf16.msra.mxu0 %v867_v12  ;;  %779 = vmatpush3.bf16.msra.mxu1 %v875_v18 }
  0xba   : > { %761 = vmatmul.mubr.bf16.vlgmr.msra.gmra.mrb[0].mxu0 %v336_v14 }
 0x18d   : > { %v442_v20 = vpop.f32.mrb[0].mxu0 }
 0x18e   : > { %v443_v21 = vadd.f32 %v704_v19, %v442_v20  ;;  %v762_v22 = vpop.f32.mrb[1].mxu0 }
 0x18f   : > { %v445_v23 = vpop.f32.mrb[2].mxu0 }
 0x190   : > { %876 = vtanh.f32 %v443_v21  ;;  %v763_v24 = vpop.f32.mrb[3].mxu0 }
 0x19a   : > { %v877_v25 = vpop.eup %876 }
 0x19b   : > { %v449_v26 = vpack.c.bf16 %v877_v25, %v877_v25 }
 0x19d   : > { %781 = vmatmul.mubr.bf16.vlgmr.msra.gmra.mrb[0].mxu1 %v449_v26 }
 0x270   : > { %v555_v29 = vpop.f32.mrb[0].mxu1 }
 0x271   : > { %v556_v30 = vadd.f32 %v713_v27, %v555_v29  ;;  %v782_v31 = vpop.f32.mrb[1].mxu1 }
 0x272   : > { %v558_v32 = vpop.f32.mrb[2].mxu1 }
 0x273   : > { %v561_v33 = vadd.f32 %v556_v30, %v334_v28  ;;  %v783_v34 = vpop.f32.mrb[3].mxu1 }
 0x275   : > { %562 = vst [vmem:[%s332_s19] sm:$0xff] %v561_v33 }
 0x276   : > { %1007 = shalt.err (!%p1004_p7)
}
 0x277   : > { %s1008_s20 = scalar_lea.hbm %s1358_s16, 128  ;;  %s1012_s8 = scalar_lea.hbm %s1408_s6, 256 }
 0x278   : > { %p1009_p1 = scmp.ne.s32.totalorder %s1358_s16, %s1008_s20  ;;  %p1013_p0 = scmp.lt.u32.totalorder %s1358_s16, %s1408_s6 }
 0x279   : > { %p1014_p9 = scmp.lt.u32.totalorder %s1012_s8, %s1008_s20  ;;  %p1016_p2 = scmp.lt.u32.totalorder %s1008_s20, %s1358_s16 }
 0x27a   : > { %p1010_p8 = pnand %p1009_p1, %p1431_p13 }
 0x27b   : > { %p1015_p12 = por %p1014_p9, %p1013_p0 }
 0x27c   : > { %p1011_p11 = pneg %p1010_p8 }
 0x27d   : > { %p1017_p6 = por %p1016_p2, %p1015_p12 }
 0x27f   : > { %p1018_p10 = pnand %p1017_p6, %p1011_p11 }
 0x281   : > { %1021 = shalt.err (!%p1018_p10)
}
 0x282   : > { %796 = dma.vmem_to_hbm [thread:$0]  (%p1431_p13), %s1360_s11, 128, %s1358_s16, %s564_s30  }
 0x283 PF: > { %s589_s13 = sand.u32 1, %s1060_s21   ;;  %p1432_p4 = scmp.ne.s32.totalorder %s1416_s28, 0 }
 0x284   : > { %p1433_p5 = scmp.ge.s32.totalorder %s1072_s24, 2  ;;  %s590_s12 = scalar_lea.sflag [#allocation4], %s589_s13 }
 0x286   : > { %p813_p3 = pnand %p1433_p5, %p1432_p4 }
 0x288   : > { %1055 = dma.done.wait (!%p813_p3), %s590_s12, 128  }
 0x289   : > { %1057 = vsyncadd (!%p813_p3), %s590_s12, 4294967168  ;;  %s1434_s2 = sld [smem:[#allocation16_spill]]  ;;  %p23_p7 = scmp.ge.s32.totalorder %s1228_s26, 4  }
 0x28a   : > { %s1435_s21 = smov %s1064_s22  ;;  %s1436_s22 = smov %s1068_s23 }
 0x28b   : > { %s1438_s24 = smov %s1228_s26  ;;  %25 = sbr.rel (!%p23_p7) target bundleno = 11 (0xb), region = 110 }
 0x28f   : > { %s1437_s23 = smov %s1434_s2 }
 0x292   :  { %595 = vsyncpa [#allocation3], 1 }
 0x293   :  { %597 = vsyncpa [#allocation3 + $0x1], 1 }
 0x294   :  { %598 = vsyncpa [#allocation6], 1 }
 0x295   :  { %600 = vsyncpa [#allocation6 + $0x1], 1 }
 0x296   :  { %601 = vsyncpa [#allocation9], 1 }
 0x297   :  { %602 = vsyncpa [#allocation4], 1 }
 0x298   :  { %604 = vsyncpa [#allocation4 + $0x1], 1 }

</bundles_post_ra>
